<compile_context>
chip_gen: v6e
topology: v6e:2x2x1
jax: 0.10.0
libtpu: 0.0.40
codegen_flags: <defaults>
</compile_context>

<pallas_src>
import functools
from typing import NamedTuple

import jax
import jax.numpy as jnp
import numpy as np
from jax.experimental import pallas as pl
from jax.experimental.pallas import tpu as pltpu

_LANE = 128


def _round_up(x, m):
    return ((x + m - 1) // m) * m


def _vmem_budget_bytes():
    """Generation-aware scoped-VMEM budget (~78% of physical capacity)."""
    try:
        cap = int(pltpu.get_tpu_info().vmem_capacity_bytes)
        return int(min(max(cap * 0.78, 32 * 1024 * 1024), 110 * 1024 * 1024))
    except Exception:
        return 48 * 1024 * 1024   # conservative fallback (fits v7x's 64 MiB)


class GraphPlan(NamedTuple):
    use_fused: bool
    rep_resident: bool
    n_users: int
    n_items: int
    n_layers: int
    Np: int
    Dp: int
    tm: int
    tk: int
    vmem_budget: int


# ---------------------------------------------------------------------------
# One-time graph preparation (hoisted out of the per-step forward).
# ---------------------------------------------------------------------------
def prepare_lightgcn_graph(norm_adj, n_users, n_items, dim, n_layers, *,
                           force_tiled=False):
    N = n_users + n_items
    budget = _vmem_budget_bytes()
    Dp = _round_up(max(dim, _LANE), _LANE)

    Np_f = _round_up(N, _LANE)
    # Fused VMEM need: adj scratch (1x bf16) + rep0/out blocks (2x f32 each)
    # + carried-rep bf16 scratch + margin.
    fused_need = 2 * Np_f * Np_f + 18 * Np_f * Dp + (2 << 20)
    use_fused = (not force_tiled) and n_layers > 0 and fused_need <= budget

    if use_fused:
        Np, tm, tk, rep_resident = Np_f, 0, 0, True
        # Transposed layout: kernel computes new^T = rep^T @ adj^T.
        adj_prep = jnp.pad(norm_adj.T.astype(jnp.bfloat16),
                           ((0, Np - N), (0, Np - N)))
    else:
        if N >= 4096:
            unit = 512
        elif N >= 1024:
            unit = 256
        else:
            unit = _LANE
        Np = _round_up(max(N, unit), unit)
        tm = unit
        tk = 2 * unit if Np % (2 * unit) == 0 else unit
        # Keep the full (Np, Dp) bf16 rep VMEM-resident if it fits; otherwise
        # stream it in (tk, Dp) blocks along the contraction axis.
        resident_need = 4 * Np * Dp + 4 * tm * tk + 24 * tm * Dp + (2 << 20)
        rep_resident = resident_need <= budget
        adj_prep = jnp.pad(norm_adj.astype(jnp.bfloat16),
                           ((0, Np - N), (0, Np - N)))

    plan = GraphPlan(use_fused, rep_resident, n_users, n_items, n_layers,
                     Np, Dp, tm, tk, budget)
    return plan, adj_prep


# ---------------------------------------------------------------------------
# Kernel 1a: fully fused multi-layer propagation + layer mean (transposed).
#   grid = (n_layers,). The bf16 adj^T is DMA'd from HBM into a VMEM scratch
#   ONCE (single-buffered); the carried layer rep is a bf16 scratch; the f32
#   layer-sum accumulates in the resident output block.
# ---------------------------------------------------------------------------
def _fused_propagate_kernel(adj_hbm_ref, rep0_ref, out_ref, adj_vmem, cur_ref,
                            *, scale):
    l = pl.program_id(0)

    @pl.when(l == 0)
    def _():
        pltpu.sync_copy(adj_hbm_ref, adj_vmem)      # HBM -> VMEM exactly once
        r0 = rep0_ref[...]
        cur_ref[...] = r0.astype(jnp.bfloat16)
        out_ref[...] = r0

    # new^T = cur^T @ adj^T : output lane/MXU width is Np (>= 256).
    new = jnp.dot(cur_ref[...], adj_vmem[...],
                  preferred_element_type=jnp.float32)
    cur_ref[...] = new.astype(jnp.bfloat16)
    out_ref[...] = out_ref[...] + new

    @pl.when(l == pl.num_programs(0) - 1)
    def _():
        out_ref[...] = out_ref[...] * jnp.float32(scale)


def _propagate_fused(adj_t_p, rep0_t_p, n_layers, vmem_budget):
    Dp, Np = rep0_t_p.shape
    kernel = functools.partial(_fused_propagate_kernel,
                               scale=1.0 / float(n_layers + 1))
    return pl.pallas_call(
        kernel,
        out_shape=jax.ShapeDtypeStruct((Dp, Np), jnp.float32),
        grid_spec=pltpu.PrefetchScalarGridSpec(
            num_scalar_prefetch=0,
            grid=(n_layers,),
            in_specs=[
                pl.BlockSpec(memory_space=pl.ANY),          # adj^T stays in HBM
                pl.BlockSpec((Dp, Np), lambda l: (0, 0)),   # rep0^T (f32)
            ],
            out_specs=pl.BlockSpec((Dp, Np), lambda l: (0, 0)),
            scratch_shapes=[
                pltpu.VMEM((Np, Np), jnp.bfloat16),         # adjacency (1x)
                pltpu.VMEM((Dp, Np), jnp.bfloat16),         # carried layer rep
            ],
        ),
        compiler_params=pltpu.CompilerParams(
            dimension_semantics=("arbitrary",),
            vmem_limit_bytes=vmem_budget,
        ),
    )(adj_t_p, rep0_t_p)


# ---------------------------------------------------------------------------
# Kernel 1b: tiled single-layer propagation with fused layer accumulation.
#   grid = (rows, k). bf16 adjacency tiles; the bf16 rep is either fully
#   VMEM-resident (sliced in-kernel) or streamed in (tk, Dp) blocks; the
#   epilogue emits the next-layer rep in bf16 and updates the aliased f32
#   running layer-sum in place.
# ---------------------------------------------------------------------------
def _tiled_layer_kernel(adj_ref, rep_ref, acc_ref, new_ref, accout_ref, psum_ref):
    k = pl.program_id(1)
    tk = adj_ref.shape[1]

    @pl.when(k == 0)
    def _():
        psum_ref[...] = jnp.zeros_like(psum_ref)

    if rep_ref.shape[0] == tk:          # streamed (or single-k) rep block
        rep_blk = rep_ref[...]
    else:                               # VMEM-resident rep: slice sublanes
        off = pl.multiple_of(k * tk, tk)
        rep_blk = rep_ref[pl.ds(off, tk), :]

    psum_ref[...] += jnp.dot(adj_ref[...], rep_blk,
                             preferred_element_type=jnp.float32)

    @pl.when(k == pl.num_programs(1) - 1)
    def _():
        new = psum_ref[...]
        new_ref[...] = new.astype(new_ref.dtype)        # bf16 next-layer rep
        accout_ref[...] = acc_ref[...] + new            # in-place layer sum


def _propagate_tiled(adj_p, rep0_p, plan):
    Np, Dp = rep0_p.shape
    tm, tk, n_layers = plan.tm, plan.tk, plan.n_layers

    if plan.rep_resident:
        rep_spec = pl.BlockSpec((Np, Dp), lambda i, k: (0, 0))
    else:
        rep_spec = pl.BlockSpec((tk, Dp), lambda i, k: (k, 0))

    layer_call = pl.pallas_call(
        _tiled_layer_kernel,
        out_shape=(jax.ShapeDtypeStruct((Np, Dp), jnp.bfloat16),   # next rep
                   jax.ShapeDtypeStruct((Np, Dp), jnp.float32)),   # layer sum
        grid_spec=pltpu.PrefetchScalarGridSpec(
            num_scalar_prefetch=0,
            grid=(Np // tm, Np // tk),
            in_specs=[
                pl.BlockSpec((tm, tk), lambda i, k: (i, k)),   # bf16 adj tile
                rep_spec,                                      # bf16 rep
                pl.BlockSpec((tm, Dp), lambda i, k: (i, 0)),   # f32 layer sum
            ],
            out_specs=(
                pl.BlockSpec((tm, Dp), lambda i, k: (i, 0)),
                pl.BlockSpec((tm, Dp), lambda i, k: (i, 0)),
            ),
            scratch_shapes=[pltpu.VMEM((tm, Dp), jnp.float32)],
        ),
        input_output_aliases={2: 1},   # acc input -> accout output (in place)
        compiler_params=pltpu.CompilerParams(
            dimension_semantics=("parallel", "arbitrary"),
            vmem_limit_bytes=plan.vmem_budget,
        ),
    )

    acc = rep0_p
    cur = rep0_p.astype(jnp.bfloat16)
    for _ in range(n_layers):
        cur, acc = layer_call(adj_p, cur, acc)
    return acc * jnp.float32(1.0 / (n_layers + 1))


# ---------------------------------------------------------------------------
# _get_rep(): concat embeddings, propagate n_layers times, layer-mean.
# ---------------------------------------------------------------------------
def lightgcn_get_rep(user_weight, item_weight, adj_prep, plan):
    N = plan.n_users + plan.n_items
    D = user_weight.shape[1]
    rep0 = jnp.concatenate([user_weight, item_weight], axis=0).astype(jnp.float32)
    if plan.n_layers == 0:
        return rep0

    rep0_p = jnp.pad(rep0, ((0, plan.Np - N), (0, plan.Dp - D)))
    if plan.use_fused:
        out_t = _propagate_fused(adj_prep, rep0_p.T, plan.n_layers,
                                 plan.vmem_budget)
        return out_t[:D, :N].T
    out = _propagate_tiled(adj_prep, rep0_p, plan)
    return out[:N, :D]


# ---------------------------------------------------------------------------
# Kernel 2: fused reg + rating-loss reduction (two scalar outputs only).
# ---------------------------------------------------------------------------
def _loss_kernel(u_ref, p_ref, n_ref, ps_ref, ns_ref, reg_ref, loss_ref, *, inv_b):
    u = u_ref[...]
    p = p_ref[...]
    n = n_ref[...]

    usq = jnp.sum(u * u, axis=1, keepdims=True)
    psq = jnp.sum(p * p, axis=1, keepdims=True)
    nsq = jnp.sum(n * n, axis=1, keepdims=True)
    pos_pred = jnp.sum(u * p, axis=1, keepdims=True)
    neg_pred = jnp.sum(u * n, axis=1, keepdims=True)

    reg_ref[...] = jnp.sum(usq + psq + nsq, axis=0, keepdims=True) * jnp.float32(inv_b)

    pe = pos_pred - ps_ref[...]
    ne = neg_pred - ns_ref[...]
    loss_ref[...] = jnp.sum(pe * pe + ne * ne, axis=0, keepdims=True) * jnp.float32(inv_b)


def bpr_losses(user_emb, pos_emb, neg_emb, pos_scores, neg_scores):
    # TODO(synk): for very large training batches, tile over B with a scratch
    #             accumulator instead of a single full-batch VMEM block.
    B, D = user_emb.shape
    Bp = _round_up(max(B, 8), 8)
    Dp = _round_up(max(D, _LANE), _LANE)

    def pad_mat(x):
        return jnp.pad(x.astype(jnp.float32), ((0, Bp - B), (0, Dp - D)))

    def pad_col(x):
        return jnp.pad(x.astype(jnp.float32).reshape(-1, 1), ((0, Bp - B), (0, 0)))

    vmem = pl.BlockSpec(memory_space=pltpu.MemorySpace.VMEM)
    kernel = functools.partial(_loss_kernel, inv_b=1.0 / float(B))
    reg, loss = pl.pallas_call(
        kernel,
        out_shape=(jax.ShapeDtypeStruct((1, 1), jnp.float32),
                   jax.ShapeDtypeStruct((1, 1), jnp.float32)),
        in_specs=[vmem] * 5,
        out_specs=(vmem, vmem),
    )(pad_mat(user_emb), pad_mat(pos_emb), pad_mat(neg_emb),
      pad_col(pos_scores), pad_col(neg_scores))
    return reg[0, 0], loss[0, 0]


# ---------------------------------------------------------------------------
# LightGCN forward (matches the PyTorch module's forward semantics)
# ---------------------------------------------------------------------------
def lightgcn_forward(adj_prep, user_weight, item_weight,
                     user_list, pos_items, neg_items, pos_scores, neg_scores,
                     *, plan):
    final_rep = lightgcn_get_rep(user_weight, item_weight, adj_prep, plan)
    user_r = final_rep[:plan.n_users]
    item_r = final_rep[plan.n_users:]

    # embedding gathers (glue)
    user_emb = jnp.take(user_r, user_list, axis=0)
    posI_emb = jnp.take(item_r, pos_items, axis=0)
    negI_emb = jnp.take(item_r, neg_items, axis=0)

    reg, rating_loss = bpr_losses(user_emb, posI_emb, negI_emb,
                                  pos_scores, neg_scores)
    return user_emb, posI_emb, negI_emb, reg, rating_loss


# ---------------------------------------------------------------------------
# Pure-JAX reference (for a sanity check)
# ---------------------------------------------------------------------------
def lightgcn_reference(user_weight, item_weight, norm_adj, n_layers,
                       user_list, pos_items, neg_items, pos_scores, neg_scores):
    n_users = user_weight.shape[0]
    rep = jnp.concatenate([user_weight, item_weight], axis=0)
    layers = [rep]
    cur = rep
    for _ in range(n_layers):
        cur = jnp.dot(norm_adj, cur, precision=jax.lax.Precision.HIGHEST)
        layers.append(cur)
    final_rep = jnp.mean(jnp.stack(layers, axis=0), axis=0)
    user_r, item_r = final_rep[:n_users], final_rep[n_users:]
    u = user_r[user_list]
    p = item_r[pos_items]
    n = item_r[neg_items]
    reg = (jnp.mean(jnp.sum(u * u, axis=1))
           + jnp.mean(jnp.sum(p * p, axis=1))
           + jnp.mean(jnp.sum(n * n, axis=1)))
    pos_pred = jnp.sum(u * p, axis=1)
    neg_pred = jnp.sum(u * n, axis=1)
    loss = (jnp.mean((pos_pred - pos_scores) ** 2)
            + jnp.mean((neg_pred - neg_scores) ** 2))
    return u, p, n, reg, loss


# ---------------------------------------------------------------------------
# Main
# ---------------------------------------------------------------------------
if __name__ == "__main__":
    n_users, n_items, dim, n_layers, batch = 96, 160, 128, 3, 8
    N = n_users + n_items

    key = jax.random.PRNGKey(0)
    k_u, k_i, k_adj, k_ul, k_pi, k_ni, k_ps, k_ns = jax.random.split(key, 8)

    # nn.Embedding weights initialized with normal_(std=0.1)
    user_weight = 0.1 * jax.random.normal(k_u, (n_users, dim), dtype=jnp.float32)
    item_weight = 0.1 * jax.random.normal(k_i, (n_items, dim), dtype=jnp.float32)

    # Synthetic symmetric-normalized bipartite adjacency (dense stand-in for
    # the sparse norm_adj graph tensor).
    inter = jax.random.bernoulli(k_adj, p=0.1, shape=(n_users, n_items)).astype(
        jnp.float32)
    adj = jnp.zeros((N, N), dtype=jnp.float32)
    adj = adj.at[:n_users, n_users:].set(inter)
    adj = adj.at[n_users:, :n_users].set(inter.T)
    deg = jnp.maximum(jnp.sum(adj, axis=1), 1.0)
    d_inv_sqrt = 1.0 / jnp.sqrt(deg)
    norm_adj = adj * d_inv_sqrt[:, None] * d_inv_sqrt[None, :]

    user_list = jax.random.randint(k_ul, (batch,), 0, n_users, dtype=jnp.int32)
    pos_items = jax.random.randint(k_pi, (batch,), 0, n_items, dtype=jnp.int32)
    neg_items = jax.random.randint(k_ni, (batch,), 0, n_items, dtype=jnp.int32)
    pos_scores = jax.random.uniform(k_ps, (batch,), dtype=jnp.float32)
    neg_scores = jax.random.uniform(k_ns, (batch,), dtype=jnp.float32)

    # One-time graph preparation (cast/pad/transposed) — hoisted out of the
    # per-step forward.
    plan_fused, adj_fused = prepare_lightgcn_graph(
        norm_adj, n_users, n_items, dim, n_layers)
    plan_tiled, adj_tiled = prepare_lightgcn_graph(
        norm_adj, n_users, n_items, dim, n_layers, force_tiled=True)

    fwd_fused = jax.jit(functools.partial(lightgcn_forward, plan=plan_fused))
    fwd_tiled = jax.jit(functools.partial(lightgcn_forward, plan=plan_tiled))

    ref = lightgcn_reference(user_weight, item_weight, norm_adj, n_layers,
                             user_list, pos_items, neg_items,
                             pos_scores, neg_scores)

    for fwd, adj_prep in ((fwd_fused, adj_fused), (fwd_tiled, adj_tiled)):
        out = fwd(adj_prep, user_weight, item_weight,
                  user_list, pos_items, neg_items, pos_scores, neg_scores)
        out = jax.block_until_ready(out)
        user_emb, posI_emb, negI_emb, reg, rating_loss = out

        # bf16 adjacency / matmul operands vs f32-HIGHEST reference.
        np.testing.assert_allclose(np.asarray(user_emb), np.asarray(ref[0]),
                                   rtol=2e-2, atol=3e-3)
        np.testing.assert_allclose(np.asarray(posI_emb), np.asarray(ref[1]),
                                   rtol=2e-2, atol=3e-3)
        np.testing.assert_allclose(np.asarray(negI_emb), np.asarray(ref[2]),
                                   rtol=2e-2, atol=3e-3)
        np.testing.assert_allclose(float(reg), float(ref[3]),
                                   rtol=2e-2, atol=1e-3)
        np.testing.assert_allclose(float(rating_loss), float(ref[4]),
                                   rtol=2e-2, atol=1e-3)

    print("KERNEL_OK")
</pallas_src>

<mosaic_0001>
module attributes {stable_mosaic.version = 11 : i64} {
  func.func @_fused_propagate_kernel(%arg0: i32, %arg1: memref<256x256xbf16, #tpu.memory_space<any>>, %arg2: memref<128x256xf32, #tpu.memory_space<vmem>>, %arg3: memref<128x256xf32, #tpu.memory_space<vmem>>, %arg4: memref<256x256xbf16, #tpu.memory_space<vmem>>, %arg5: memref<128x256xbf16, #tpu.memory_space<vmem>>) attributes {dimension_semantics = [#tpu.dimension_semantics<arbitrary>], iteration_bounds = array<i64: 3>, scalar_prefetch = 0 : i64, scratch_operands = 2 : i64, tpu.core_type = #tpu.core_type<tc>, window_params = [{}, {pipeline_mode = #tpu.pipeline_mode<synchronous>, transform_indices = @transform_1, window_bounds = array<i64: 128, 256>}, {pipeline_mode = #tpu.pipeline_mode<synchronous>, transform_indices = @transform_2, window_bounds = array<i64: 128, 256>}]} {
    %c0_i32 = arith.constant 0 : i32
    %0 = arith.cmpi eq, %arg0, %c0_i32 : i32
    %1 = arith.extui %0 : i1 to i32
    %c0_i32_0 = arith.constant 0 : i32
    %2 = arith.cmpi ne, %1, %c0_i32_0 : i32
    scf.if %2 {
      "tpu.region"() ({
        %18 = tpu.sem_alloc : memref<!tpu.dma_semaphore, #tpu.memory_space<semaphore_mem>>
        tpu.enqueue_dma source(%arg1 : memref<256x256xbf16, #tpu.memory_space<any>>) target(%arg4 : memref<256x256xbf16, #tpu.memory_space<vmem>>) target_semaphore(%18 : memref<!tpu.dma_semaphore, #tpu.memory_space<semaphore_mem>>)
        tpu.wait_dma2 semaphore(%18 : memref<!tpu.dma_semaphore, #tpu.memory_space<semaphore_mem>>) src(%arg1 : memref<256x256xbf16, #tpu.memory_space<any>>) dst(%arg4 : memref<256x256xbf16, #tpu.memory_space<vmem>>)
        tpu.yield
      }) : () -> ()
      %c0_11 = arith.constant 0 : index
      %c0_12 = arith.constant 0 : index
      %14 = vector.load %arg2[%c0_11, %c0_12] : memref<128x256xf32, #tpu.memory_space<vmem>>, vector<128x256xf32>
      %15 = arith.truncf %14 : vector<128x256xf32> to vector<128x256xbf16>
      %c0_13 = arith.constant 0 : index
      %c0_14 = arith.constant 0 : index
      %16 = vector.load %arg5[%c0_13, %c0_14] : memref<128x256xbf16, #tpu.memory_space<vmem>>, vector<128x256xbf16>
      tpu.vector_store %arg5[%c0_13, %c0_14], %15 {strides = array<i32>} : memref<128x256xbf16, #tpu.memory_space<vmem>>, vector<128x256xbf16>,
      %c0_15 = arith.constant 0 : index
      %c0_16 = arith.constant 0 : index
      %17 = vector.load %arg3[%c0_15, %c0_16] : memref<128x256xf32, #tpu.memory_space<vmem>>, vector<128x256xf32>
      tpu.vector_store %arg3[%c0_15, %c0_16], %14 {strides = array<i32>} : memref<128x256xf32, #tpu.memory_space<vmem>>, vector<128x256xf32>,
    } else {
    }
    %c0 = arith.constant 0 : index
    %c0_1 = arith.constant 0 : index
    %3 = vector.load %arg5[%c0, %c0_1] : memref<128x256xbf16, #tpu.memory_space<vmem>>, vector<128x256xbf16>
    %c0_2 = arith.constant 0 : index
    %c0_3 = arith.constant 0 : index
    %4 = vector.load %arg4[%c0_2, %c0_3] : memref<256x256xbf16, #tpu.memory_space<vmem>>, vector<256x256xbf16>
    %cst = arith.constant dense<0.000000e+00> : vector<128x256xf32>
    %5 = tpu.matmul %3, %4, %cst {dimension_numbers = #tpu.dot_dimension_numbers<[1], [0], [0], [1], [0, 0, 1, 1], [], []>} : vector<128x256xbf16>, vector<256x256xbf16>, vector<128x256xf32> -> vector<128x256xf32>
    %6 = arith.truncf %5 : vector<128x256xf32> to vector<128x256xbf16>
    %c0_4 = arith.constant 0 : index
    %c0_5 = arith.constant 0 : index
    %7 = vector.load %arg5[%c0_4, %c0_5] : memref<128x256xbf16, #tpu.memory_space<vmem>>, vector<128x256xbf16>
    tpu.vector_store %arg5[%c0_4, %c0_5], %6 {strides = array<i32>} : memref<128x256xbf16, #tpu.memory_space<vmem>>, vector<128x256xbf16>,
    %c0_6 = arith.constant 0 : index
    %c0_7 = arith.constant 0 : index
    %8 = vector.load %arg3[%c0_6, %c0_7] : memref<128x256xf32, #tpu.memory_space<vmem>>, vector<128x256xf32>
    %9 = arith.addf %8, %5 : vector<128x256xf32>
    %c0_8 = arith.constant 0 : index
    %c0_9 = arith.constant 0 : index
    %10 = vector.load %arg3[%c0_8, %c0_9] : memref<128x256xf32, #tpu.memory_space<vmem>>, vector<128x256xf32>
    tpu.vector_store %arg3[%c0_8, %c0_9], %9 {strides = array<i32>} : memref<128x256xf32, #tpu.memory_space<vmem>>, vector<128x256xf32>,
    %c2_i32 = arith.constant 2 : i32
    %11 = arith.cmpi eq, %arg0, %c2_i32 : i32
    %12 = arith.extui %11 : i1 to i32
    %c0_i32_10 = arith.constant 0 : i32
    %13 = arith.cmpi ne, %12, %c0_i32_10 : i32
    scf.if %13 {
      %c0_11 = arith.constant 0 : index
      %c0_12 = arith.constant 0 : index
      %14 = vector.load %arg3[%c0_11, %c0_12] : memref<128x256xf32, #tpu.memory_space<vmem>>, vector<128x256xf32>
      %cst_13 = arith.constant 2.500000e-01 : f32
      %15 = vector.broadcast %cst_13 : f32 to vector<128x256xf32>
      %16 = arith.mulf %14, %15 : vector<128x256xf32>
      %c0_14 = arith.constant 0 : index
      %c0_15 = arith.constant 0 : index
      %17 = vector.load %arg3[%c0_14, %c0_15] : memref<128x256xf32, #tpu.memory_space<vmem>>, vector<128x256xf32>
      tpu.vector_store %arg3[%c0_14, %c0_15], %16 {strides = array<i32>} : memref<128x256xf32, #tpu.memory_space<vmem>>, vector<128x256xf32>,
    } else {
    }
    return
  }
  func.func @transform_1(%arg0: i32) -> (i32, i32) {
    %c0_i32 = arith.constant 0 : i32
    %c0_i32_0 = arith.constant 0 : i32
    %c0_i32_1 = arith.constant 0 : i32
    return %c0_i32, %c0_i32_0 : i32, i32
  }
  func.func @transform_2(%arg0: i32) -> (i32, i32) {
    %c0_i32 = arith.constant 0 : i32
    %c0_i32_0 = arith.constant 0 : i32
    %c0_i32_1 = arith.constant 0 : i32
    return %c0_i32, %c0_i32_0 : i32, i32
  }
}

module attributes {stable_mosaic.version = 11 : i64} {
  func.func @_loss_kernel(%arg0: memref<8x128xf32, #tpu.memory_space<vmem>>, %arg1: memref<8x128xf32, #tpu.memory_space<vmem>>, %arg2: memref<8x128xf32, #tpu.memory_space<vmem>>, %arg3: memref<8x1xf32, #tpu.memory_space<vmem>>, %arg4: memref<8x1xf32, #tpu.memory_space<vmem>>, %arg5: memref<1x1xf32, #tpu.memory_space<vmem>>, %arg6: memref<1x1xf32, #tpu.memory_space<vmem>>) attributes {dimension_semantics = [], scalar_prefetch = 0 : i64, scratch_operands = 0 : i64, tpu.core_type = #tpu.core_type<tc>} {
    %c0 = arith.constant 0 : index
    %c0_0 = arith.constant 0 : index
    %0 = vector.load %arg0[%c0, %c0_0] : memref<8x128xf32, #tpu.memory_space<vmem>>, vector<8x128xf32>
    %c0_1 = arith.constant 0 : index
    %c0_2 = arith.constant 0 : index
    %1 = vector.load %arg1[%c0_1, %c0_2] : memref<8x128xf32, #tpu.memory_space<vmem>>, vector<8x128xf32>
    %c0_3 = arith.constant 0 : index
    %c0_4 = arith.constant 0 : index
    %2 = vector.load %arg2[%c0_3, %c0_4] : memref<8x128xf32, #tpu.memory_space<vmem>>, vector<8x128xf32>
    %3 = arith.mulf %0, %0 : vector<8x128xf32>
    %cst = arith.constant dense<0.000000e+00> : vector<8xf32>
    %4 = vector.multi_reduction <add>, %3, %cst [1] : vector<8x128xf32> to vector<8xf32>
    %5 = vector.shape_cast %4 : vector<8xf32> to vector<8x1xf32>
    %6 = arith.mulf %1, %1 : vector<8x128xf32>
    %cst_5 = arith.constant dense<0.000000e+00> : vector<8xf32>
    %7 = vector.multi_reduction <add>, %6, %cst_5 [1] : vector<8x128xf32> to vector<8xf32>
    %8 = vector.shape_cast %7 : vector<8xf32> to vector<8x1xf32>
    %9 = arith.mulf %2, %2 : vector<8x128xf32>
    %cst_6 = arith.constant dense<0.000000e+00> : vector<8xf32>
    %10 = vector.multi_reduction <add>, %9, %cst_6 [1] : vector<8x128xf32> to vector<8xf32>
    %11 = vector.shape_cast %10 : vector<8xf32> to vector<8x1xf32>
    %12 = arith.mulf %0, %1 : vector<8x128xf32>
    %cst_7 = arith.constant dense<0.000000e+00> : vector<8xf32>
    %13 = vector.multi_reduction <add>, %12, %cst_7 [1] : vector<8x128xf32> to vector<8xf32>
    %14 = vector.shape_cast %13 : vector<8xf32> to vector<8x1xf32>
    %15 = arith.mulf %0, %2 : vector<8x128xf32>
    %cst_8 = arith.constant dense<0.000000e+00> : vector<8xf32>
    %16 = vector.multi_reduction <add>, %15, %cst_8 [1] : vector<8x128xf32> to vector<8xf32>
    %17 = vector.shape_cast %16 : vector<8xf32> to vector<8x1xf32>
    %18 = arith.addf %5, %8 : vector<8x1xf32>
    %19 = arith.addf %18, %11 : vector<8x1xf32>
    %cst_9 = arith.constant dense<0.000000e+00> : vector<1xf32>
    %20 = vector.multi_reduction <add>, %19, %cst_9 [0] : vector<8x1xf32> to vector<1xf32>
    %21 = vector.shape_cast %20 : vector<1xf32> to vector<1x1xf32>
    %cst_10 = arith.constant 1.250000e-01 : f32
    %22 = vector.broadcast %cst_10 : f32 to vector<1x1xf32>
    %23 = arith.mulf %21, %22 : vector<1x1xf32>
    %c0_11 = arith.constant 0 : index
    %c0_12 = arith.constant 0 : index
    %24 = vector.load %arg5[%c0_11, %c0_12] : memref<1x1xf32, #tpu.memory_space<vmem>>, vector<1x1xf32>
    tpu.vector_store %arg5[%c0_11, %c0_12], %23 {strides = array<i32>} : memref<1x1xf32, #tpu.memory_space<vmem>>, vector<1x1xf32>,
    %c0_13 = arith.constant 0 : index
    %c0_14 = arith.constant 0 : index
    %25 = vector.load %arg3[%c0_13, %c0_14] : memref<8x1xf32, #tpu.memory_space<vmem>>, vector<8x1xf32>
    %26 = arith.subf %14, %25 : vector<8x1xf32>
    %c0_15 = arith.constant 0 : index
    %c0_16 = arith.constant 0 : index
    %27 = vector.load %arg4[%c0_15, %c0_16] : memref<8x1xf32, #tpu.memory_space<vmem>>, vector<8x1xf32>
    %28 = arith.subf %17, %27 : vector<8x1xf32>
    %29 = arith.mulf %26, %26 : vector<8x1xf32>
    %30 = arith.mulf %28, %28 : vector<8x1xf32>
    %31 = arith.addf %29, %30 : vector<8x1xf32>
    %cst_17 = arith.constant dense<0.000000e+00> : vector<1xf32>
    %32 = vector.multi_reduction <add>, %31, %cst_17 [0] : vector<8x1xf32> to vector<1xf32>
    %33 = vector.shape_cast %32 : vector<1xf32> to vector<1x1xf32>
    %cst_18 = arith.constant 1.250000e-01 : f32
    %34 = vector.broadcast %cst_18 : f32 to vector<1x1xf32>
    %35 = arith.mulf %33, %34 : vector<1x1xf32>
    %c0_19 = arith.constant 0 : index
    %c0_20 = arith.constant 0 : index
    %36 = vector.load %arg6[%c0_19, %c0_20] : memref<1x1xf32, #tpu.memory_space<vmem>>, vector<1x1xf32>
    tpu.vector_store %arg6[%c0_19, %c0_20], %35 {strides = array<i32>} : memref<1x1xf32, #tpu.memory_space<vmem>>, vector<1x1xf32>,
    return
  }
}

</mosaic_0001>

<bundles_post_ra>
// kernel: lightgcn_forward.3
= control target key start
LH: loop header
LB: loop body
LE: loop exit
PB: predicated region body
PF: predicated region fallthrough
CT: control target
= control target key end

     0   :  { %12 = vsyncpa [#allocation3], 0  ;;  %s204_s0 = inlined_call_operand.vmem [shape: f32[8,128], index: 0, kind: input, shape index: {}]   ;;  %s205_s1 = inlined_call_operand.vmem [shape: f32[8,128], index: 1, kind: input, shape index: {}]   ;;  %s206_s2 = inlined_call_operand.vmem [shape: f32[8,128], index: 2, kind: input, shape index: {}]   ;;  %s207_s3 = inlined_call_operand.vmem [shape: f32[8,1], index: 3, kind: input, shape index: {}]   ;;  %s208_s4 = inlined_call_operand.vmem [shape: f32[8,1], index: 4, kind: input, shape index: {}]   ;;  %s209_s5 = inlined_call_operand.hbm [shape: f32[1,1], index: 5, kind: output, shape index: {0}]   ;;  %s210_s6 = inlined_call_operand.hbm [shape: f32[1,1], index: 6, kind: output, shape index: {1}]  }
   0x1   :  { %v24_v0 = vld [vmem:[%s204_s0] sm:$0xff] }
   0x2   :  { %v25_v1 = vld [vmem:[%s205_s1] sm:$0xff]  ;;  %v27_v4 = vmul.f32 %v24_v0, %v24_v0 }
   0x3   :  { %v26_v2 = vld [vmem:[%s206_s2] sm:$0xff]  ;;  %v36_v3 = vmul.f32 %v25_v1, %v24_v0 }
   0x4   :  { %13 = vsyncpa [#allocation5], 0  ;;  %28 = vadd.xlane.f32.xlu1 %v27_v4  ;;  %v39_v5 = vmul.f32 %v26_v2, %v24_v0  ;;  %v30_v6 = vmul.f32 %v25_v1, %v25_v1  ;;  %v33_v7 = vmul.f32 %v26_v2, %v26_v2  ;;  %v53_v8 = vld [vmem:[%s207_s3] sm:$0xff]  ;;  %vm60_vm0 = vcmask 7168   ;;  %s144_s2 = smov [#allocation2]  }
   0x5   :  { %37 = vadd.xlane.f32.xlu0 %v36_v3  ;;  %v55_v11 = vld [vmem:[%s208_s4] sm:$0xff]  ;;  %s76_s3 = sshll.u32 %s144_s2, 4  ;;  %s145_s4 = smov [#allocation4]   ;;  %vm51_vm1 = vcmask 0   ;;  %s77_s3 = int_to_ptr.vmem [resolvable:$true] %s76_s3 }
   0x6   :  { %s86_s29 = sshll.u32 %s145_s4, 4  ;;  %s100_s30 = scalar_lea.vmem %s77_s3, 16  ;;  %s87_s29 = int_to_ptr.vmem [resolvable:$true] %s86_s29 }
   0x7   :  { %p101_p0 = scmp.ne.s32.totalorder %s77_s3, %s100_s30  ;;  %s104_s7 = scalar_lea.vmem %s77_s3, 32 }
   0x8   :  { %31 = vadd.xlane.f32.xlu1 %v30_v6  ;;  %p105_p1 = scmp.lt.s32.totalorder %s77_s3, %s77_s3  ;;  %p106_p2 = scmp.lt.s32.totalorder %s104_s7, %s100_s30 }
   0x9   :  { %40 = vadd.xlane.f32.xlu0 %v39_v5 }
   0xa   :  { %p107_p3 = por %p106_p2, %p105_p1 }
   0xc   :  { %p108_p4 = pnand %p107_p3, %p101_p0 }
   0xd   :  { %34 = vadd.xlane.f32.xlu0 %v33_v7 }
  0x8d   :  { %v29_v10 = vpop.xlane.xlu1 %28 }
  0x8e   :  { %v38_v9 = vpop.xlane.xlu0 %37 }
  0x8f   :  { %v54_v12 = vsub.f32 %v38_v9, %v53_v8 }
  0x91   :  { %v32_v14 = vpop.xlane.xlu1 %31  ;;  %v57_v16 = vmul.f32 %v54_v12, %v54_v12 }
  0x92   :  { %v41_v13 = vpop.xlane.xlu0 %40  ;;  %v42_v18 = vadd.f32 %v32_v14, %v29_v10 }
  0x93   :  { %v56_v15 = vsub.f32 %v41_v13, %v55_v11 }
  0x95   :  { %v58_v17 = vmul.f32 %v56_v15, %v56_v15 }
  0x96   :  { %v35_v19 = vpop.xlane.xlu0 %34 }
  0x97   :  { %v59_v20 = vadd.f32 %v58_v17, %v57_v16  ;;  %v43_v21 = vadd.f32 %v42_v18, %v35_v19 }
  0x99   :  { %v61_v22 = vsel %vm60_vm0, %v59_v20, 0.0  ;;  %v44_v23 = vrot.slane %v43_v21, 4 }
  0x9a   :  { %v62_v24 = vrot.slane %v61_v22, 4 }
  0x9b   :  { %v45_v25 = vadd.f32 %v44_v23, %v43_v21 }
  0x9c   :  { %v63_v26 = vadd.f32 %v62_v24, %v61_v22 }
  0x9d   :  { %v46_v27 = vrot.slane %v45_v25, 2 }
  0x9e   :  { %v64_v28 = vrot.slane %v63_v26, 2 }
  0x9f   :  { %v47_v29 = vadd.f32 %v46_v27, %v45_v25 }
  0xa0   :  { %v65_v30 = vadd.f32 %v64_v28, %v63_v26 }
  0xa1   :  { %v48_v31 = vrot.slane %v47_v29, 1 }
  0xa2   :  { %v66_v32 = vrot.slane %v65_v30, 1 }
  0xa3   :  { %v49_v33 = vadd.f32 %v48_v31, %v47_v29 }
  0xa4   :  { %v67_v34 = vadd.f32 %v66_v32, %v65_v30 }
  0xa5   :  { %v50_v35 = vmul.f32 0.125, %v49_v33 }
  0xa6   :  { %v68_v36 = vmul.f32 0.125, %v67_v34 }
  0xa7   :  { %52 = vst.msk [vmem:[#allocation2] sm:$0x1] %vm51_vm1, %v50_v35 }
  0xa8   :  { %111 = shalt.err (!%p108_p4)
}
  0xa9   :  { %79 = dma.vmem_to_hbm [thread:$0]  %s77_s3, 16, %s209_s5, [#allocation3]   ;;  %69 = vst.msk [vmem:[#allocation4] sm:$0x1] %vm51_vm1, %v68_v36 }
  0xaa   :  { %s120_s10 = scalar_lea.vmem %s87_s29, 16  ;;  %s124_s11 = scalar_lea.vmem %s87_s29, 32 }
  0xab   :  { %p121_p5 = scmp.ne.s32.totalorder %s87_s29, %s120_s10  ;;  %p125_p6 = scmp.lt.s32.totalorder %s87_s29, %s87_s29 }
  0xac   :  { %p126_p7 = scmp.lt.s32.totalorder %s124_s11, %s120_s10 }
  0xae   :  { %p127_p8 = por %p126_p7, %p125_p6 }
  0xb0   :  { %p128_p9 = pnand %p127_p8, %p121_p5 }
  0xb2   :  { %131 = shalt.err (!%p128_p9)
}
  0xb3   :  { %89 = dma.vmem_to_hbm [thread:$0]  %s87_s29, 16, %s210_s6, [#allocation5]  }
  0xb4   :  { %140 = dma.done.wait [#allocation3], 16  }
  0xb5   :  { %141 = vsyncadd [#allocation3], 4294967280 }
  0xb6   :  { %142 = dma.done.wait [#allocation5], 16  }
  0xb7   :  { %143 = vsyncadd [#allocation5], 4294967280 }
  0xb8   :  { %96 = vsyncpa [#allocation3], 1 }
  0xb9   :  { %97 = vsyncpa [#allocation5], 1 }

// kernel: lightgcn_forward.2
= control target key start
LH: loop header
LB: loop body
LE: loop exit
PB: predicated region body
PF: predicated region fallthrough
CT: control target
= control target key end

     0   :  { %s1352_s9 = smov 0   ;;  %s2039_s0 = inlined_call_operand.vmem [shape: bf16[256,256], index: 0, kind: input, shape index: {}]   ;;  %s2040_s1 = inlined_call_operand.vmem [shape: f32[128,256], index: 1, kind: input, shape index: {}]   ;;  %s2041_s2 = inlined_call_operand.vmem [shape: f32[128,256], index: 2, kind: output, shape index: {}]  }
   0x1 LB: > { %s1105_s10 = sadd.s32 4294967295, %s1335_s9   ;;  %p1107_p0 = scmp.ge.s32.totalorder %s1335_s9, 1  ;;  %s1335_s9 = sphi %s1352_s9, %s12_s9  }
   0x2   : > { %p73_p1 = scmp.lt.s32.totalorder %s1335_s9, 4 }
   0x4   : > { %p74_p2 = pnand %p1107_p0, %p73_p1 }
   0x5   : > { %p1108_p3 = scmp.ne.s32.totalorder (!%p74_p2), %s1105_s10, 0 }
   0x6   : > { %77 = sbr.rel (%p74_p2) target bundleno = 371 (0x173), region = 24 }
   0xb   : > { %86 = sbr.rel (%p1108_p3) target bundleno = 60 (0x3c), region = 28 }
  0x10   : > { %v120_v0 = vld [vmem:[%s2039_s0] sm:$0xff]  ;;  %v122_v1 = vld [vmem:[%s2039_s0 + $0x8] sm:$0xff]  ;;  %v124_v2 = vld [vmem:[%s2039_s0 + $0x10] sm:$0xff] }
  0x11   : > { %121 = vst [vmem:[#allocation2 + $0xb0] sm:$0xff] %v120_v0  ;;  %123 = vst [vmem:[#allocation2] sm:$0xff] %v122_v1  ;;  %v126_v3 = vld [vmem:[%s2039_s0 + $0x18] sm:$0xff]  ;;  %v128_v4 = vld [vmem:[%s2039_s0 + $0x20] sm:$0xff] }
  0x12   : > { %125 = vst [vmem:[#allocation2 + $0xd8] sm:$0xff] %v124_v2  ;;  %v130_v5 = vld [vmem:[%s2039_s0 + $0x28] sm:$0xff]  ;;  %127 = vst [vmem:[#allocation2 + $0x18] sm:$0xff] %v126_v3  ;;  %v132_v6 = vld [vmem:[%s2039_s0 + $0x30] sm:$0xff] }
  0x13   : > { %129 = vst [vmem:[#allocation2 + $0x50] sm:$0xff] %v128_v4  ;;  %131 = vst [vmem:[#allocation2 + $0x68] sm:$0xff] %v130_v5  ;;  %v134_v7 = vld [vmem:[%s2039_s0 + $0x38] sm:$0xff]  ;;  %v136_v8 = vld [vmem:[%s2039_s0 + $0x40] sm:$0xff] }
  0x14   : > { %133 = vst [vmem:[#allocation2 + $0x30] sm:$0xff] %v132_v6  ;;  %135 = vst [vmem:[#allocation2 + $0x48] sm:$0xff] %v134_v7  ;;  %v138_v9 = vld [vmem:[%s2039_s0 + $0x48] sm:$0xff]  ;;  %v140_v10 = vld [vmem:[%s2039_s0 + $0x50] sm:$0xff] }
  0x15   : > { %137 = vst [vmem:[#allocation2 + $0x80] sm:$0xff] %v136_v8  ;;  %v142_v11 = vld [vmem:[%s2039_s0 + $0x58] sm:$0xff]  ;;  %139 = vst [vmem:[#allocation2 + $0x88] sm:$0xff] %v138_v9  ;;  %v144_v12 = vld [vmem:[%s2039_s0 + $0x60] sm:$0xff] }
  0x16   : > { %141 = vst [vmem:[#allocation2 + $0xe8] sm:$0xff] %v140_v10  ;;  %143 = vst [vmem:[#allocation2 + $0xb8] sm:$0xff] %v142_v11  ;;  %v146_v13 = vld [vmem:[%s2039_s0 + $0x68] sm:$0xff]  ;;  %v148_v14 = vld [vmem:[%s2039_s0 + $0x70] sm:$0xff] }
  0x17   : > { %145 = vst [vmem:[#allocation2 + $0x60] sm:$0xff] %v144_v12  ;;  %147 = vst [vmem:[#allocation2 + $0xf0] sm:$0xff] %v146_v13  ;;  %v150_v15 = vld [vmem:[%s2039_s0 + $0x78] sm:$0xff]  ;;  %v152_v16 = vld [vmem:[%s2039_s0 + $0x80] sm:$0xff] }
  0x18   : > { %149 = vst [vmem:[#allocation2 + $0x8] sm:$0xff] %v148_v14  ;;  %v154_v17 = vld [vmem:[%s2039_s0 + $0x88] sm:$0xff]  ;;  %151 = vst [vmem:[#allocation2 + $0x78] sm:$0xff] %v150_v15  ;;  %v156_v18 = vld [vmem:[%s2039_s0 + $0x90] sm:$0xff] }
  0x19   : > { %153 = vst [vmem:[#allocation2 + $0x38] sm:$0xff] %v152_v16  ;;  %155 = vst [vmem:[#allocation2 + $0x58] sm:$0xff] %v154_v17  ;;  %v158_v19 = vld [vmem:[%s2039_s0 + $0x98] sm:$0xff]  ;;  %v160_v20 = vld [vmem:[%s2039_s0 + $0xa0] sm:$0xff] }
  0x1a   : > { %157 = vst [vmem:[#allocation2 + $0x40] sm:$0xff] %v156_v18  ;;  %159 = vst [vmem:[#allocation2 + $0xc8] sm:$0xff] %v158_v19  ;;  %v162_v21 = vld [vmem:[%s2039_s0 + $0xa8] sm:$0xff]  ;;  %v164_v22 = vld [vmem:[%s2039_s0 + $0xb0] sm:$0xff] }
  0x1b   : > { %161 = vst [vmem:[#allocation2 + $0xe0] sm:$0xff] %v160_v20  ;;  %v166_v23 = vld [vmem:[%s2039_s0 + $0xb8] sm:$0xff]  ;;  %163 = vst [vmem:[#allocation2 + $0x90] sm:$0xff] %v162_v21  ;;  %v168_v24 = vld [vmem:[%s2039_s0 + $0xc0] sm:$0xff] }
  0x1c   : > { %165 = vst [vmem:[#allocation2 + $0x70] sm:$0xff] %v164_v22  ;;  %167 = vst [vmem:[#allocation2 + $0xc0] sm:$0xff] %v166_v23  ;;  %v170_v25 = vld [vmem:[%s2039_s0 + $0xc8] sm:$0xff]  ;;  %v172_v26 = vld [vmem:[%s2039_s0 + $0xd0] sm:$0xff] }
  0x1d   : > { %169 = vst [vmem:[#allocation2 + $0xa8] sm:$0xff] %v168_v24  ;;  %171 = vst [vmem:[#allocation2 + $0xd0] sm:$0xff] %v170_v25  ;;  %v174_v27 = vld [vmem:[%s2039_s0 + $0xd8] sm:$0xff]  ;;  %v176_v28 = vld [vmem:[%s2039_s0 + $0xe0] sm:$0xff] }
  0x1e   : > { %173 = vst [vmem:[#allocation2 + $0x10] sm:$0xff] %v172_v26  ;;  %v178_v29 = vld [vmem:[%s2039_s0 + $0xe8] sm:$0xff]  ;;  %175 = vst [vmem:[#allocation2 + $0x28] sm:$0xff] %v174_v27  ;;  %v180_v30 = vld [vmem:[%s2039_s0 + $0xf0] sm:$0xff] }
  0x1f   : > { %177 = vst [vmem:[#allocation2 + $0xa0] sm:$0xff] %v176_v28  ;;  %179 = vst [vmem:[#allocation2 + $0xf8] sm:$0xff] %v178_v29  ;;  %v182_v31 = vld [vmem:[%s2039_s0 + $0xf8] sm:$0xff] }
  0x20   : > { %181 = vst [vmem:[#allocation2 + $0x20] sm:$0xff] %v180_v30  ;;  %183 = vst [vmem:[#allocation2 + $0x98] sm:$0xff] %v182_v31 }
  0x21   : > { %191 = vsyncadd [#allocation4], 4096 }
  0x22   : > { %1331 = dma.done.wait [#allocation4], 4096 }
  0x23   : > { %1332 = vsyncadd [#allocation4], 4294963200  ;;  %v196_v32 = vld [vmem:[%s2040_s1] sm:$0xff]  ;;  %v197_v33 = vld [vmem:[%s2040_s1 + $0x8] sm:$0xff] }
  0x24   : > { %v198_v34 = vld [vmem:[%s2040_s1 + $0x10] sm:$0xff]  ;;  %v1192_v35 = vpack.c.bf16 %v197_v33, %v196_v32  ;;  %340 = vst [vmem:[%s2041_s2] sm:$0xff] %v196_v32  ;;  %341 = vst [vmem:[%s2041_s2 + $0x8] sm:$0xff] %v197_v33  ;;  %v199_v36 = vld [vmem:[%s2040_s1 + $0x18] sm:$0xff] }
  0x25   : > { %342 = vst [vmem:[%s2041_s2 + $0x10] sm:$0xff] %v198_v34  ;;  %v200_v37 = vld [vmem:[%s2040_s1 + $0x20] sm:$0xff]  ;;  %v201_v38 = vld [vmem:[%s2040_s1 + $0x28] sm:$0xff]  ;;  %v1193_v39 = vpack.c.bf16 %v199_v36, %v198_v34  ;;  %343 = vst [vmem:[%s2041_s2 + $0x18] sm:$0xff] %v199_v36 }
  0x26   : > { %v1194_v40 = vpack.c.bf16 %v201_v38, %v200_v37  ;;  %344 = vst [vmem:[%s2041_s2 + $0x20] sm:$0xff] %v200_v37  ;;  %345 = vst [vmem:[%s2041_s2 + $0x28] sm:$0xff] %v201_v38  ;;  %v202_v41 = vld [vmem:[%s2040_s1 + $0x30] sm:$0xff]  ;;  %v203_v42 = vld [vmem:[%s2040_s1 + $0x38] sm:$0xff] }
  0x27   : > { %v204_v43 = vld [vmem:[%s2040_s1 + $0x40] sm:$0xff]  ;;  %324 = vst [vmem:[#allocation3] sm:$0xff] %v1192_v35  ;;  %v1195_v44 = vpack.c.bf16 %v203_v42, %v202_v41  ;;  %346 = vst [vmem:[%s2041_s2 + $0x30] sm:$0xff] %v202_v41  ;;  %v205_v45 = vld [vmem:[%s2040_s1 + $0x48] sm:$0xff] }
  0x28   : > { %347 = vst [vmem:[%s2041_s2 + $0x38] sm:$0xff] %v203_v42  ;;  %348 = vst [vmem:[%s2041_s2 + $0x40] sm:$0xff] %v204_v43  ;;  %v206_v46 = vld [vmem:[%s2040_s1 + $0x50] sm:$0xff]  ;;  %v207_v47 = vld [vmem:[%s2040_s1 + $0x58] sm:$0xff]  ;;  %v1196_v48 = vpack.c.bf16 %v205_v45, %v204_v43 }
  0x29   : > { %325 = vst [vmem:[#allocation3 + $0x48] sm:$0xff] %v1193_v39  ;;  %326 = vst [vmem:[#allocation3 + $0x68] sm:$0xff] %v1194_v40  ;;  %v1197_v49 = vpack.c.bf16 %v207_v47, %v206_v46  ;;  %v208_v50 = vld [vmem:[%s2040_s1 + $0x60] sm:$0xff]  ;;  %v209_v51 = vld [vmem:[%s2040_s1 + $0x68] sm:$0xff] }
  0x2a   : > { %349 = vst [vmem:[%s2041_s2 + $0x48] sm:$0xff] %v205_v45  ;;  %350 = vst [vmem:[%s2041_s2 + $0x50] sm:$0xff] %v206_v46  ;;  %v210_v52 = vld [vmem:[%s2040_s1 + $0x70] sm:$0xff]  ;;  %v1198_v53 = vpack.c.bf16 %v209_v51, %v208_v50  ;;  %v211_v54 = vld [vmem:[%s2040_s1 + $0x78] sm:$0xff] }
  0x2b   : > { %351 = vst [vmem:[%s2041_s2 + $0x58] sm:$0xff] %v207_v47  ;;  %327 = vst [vmem:[#allocation3 + $0x78] sm:$0xff] %v1195_v44  ;;  %v212_v55 = vld [vmem:[%s2040_s1 + $0x80] sm:$0xff]  ;;  %v213_v56 = vld [vmem:[%s2040_s1 + $0x88] sm:$0xff]  ;;  %v1199_v57 = vpack.c.bf16 %v211_v54, %v210_v52 }
  0x2c   : > { %352 = vst [vmem:[%s2041_s2 + $0x60] sm:$0xff] %v208_v50  ;;  %353 = vst [vmem:[%s2041_s2 + $0x68] sm:$0xff] %v209_v51  ;;  %v1200_v58 = vpack.c.bf16 %v213_v56, %v212_v55  ;;  %v214_v59 = vld [vmem:[%s2040_s1 + $0x90] sm:$0xff]  ;;  %v215_v60 = vld [vmem:[%s2040_s1 + $0x98] sm:$0xff] }
  0x2d   : > { %354 = vst [vmem:[%s2041_s2 + $0x70] sm:$0xff] %v210_v52  ;;  %328 = vst [vmem:[#allocation3 + $0x8] sm:$0xff] %v1196_v48  ;;  %v216_v61 = vld [vmem:[%s2040_s1 + $0xa0] sm:$0xff]  ;;  %v1201_v62 = vpack.c.bf16 %v215_v60, %v214_v59  ;;  %v217_v63 = vld [vmem:[%s2040_s1 + $0xa8] sm:$0xff] }
  0x2e   : > { %329 = vst [vmem:[#allocation3 + $0x50] sm:$0xff] %v1197_v49  ;;  %355 = vst [vmem:[%s2041_s2 + $0x78] sm:$0xff] %v211_v54  ;;  %v218_v0 = vld [vmem:[%s2040_s1 + $0xb0] sm:$0xff]  ;;  %v219_v1 = vld [vmem:[%s2040_s1 + $0xb8] sm:$0xff]  ;;  %v1202_v2 = vpack.c.bf16 %v217_v63, %v216_v61 }
  0x2f   : > { %356 = vst [vmem:[%s2041_s2 + $0x80] sm:$0xff] %v212_v55  ;;  %357 = vst [vmem:[%s2041_s2 + $0x88] sm:$0xff] %v213_v56  ;;  %v1203_v3 = vpack.c.bf16 %v219_v1, %v218_v0  ;;  %v220_v4 = vld [vmem:[%s2040_s1 + $0xc0] sm:$0xff]  ;;  %v221_v5 = vld [vmem:[%s2040_s1 + $0xc8] sm:$0xff] }
  0x30   : > { %330 = vst [vmem:[#allocation3 + $0x40] sm:$0xff] %v1198_v53  ;;  %358 = vst [vmem:[%s2041_s2 + $0x90] sm:$0xff] %v214_v59  ;;  %v222_v6 = vld [vmem:[%s2040_s1 + $0xd0] sm:$0xff]  ;;  %v1204_v7 = vpack.c.bf16 %v221_v5, %v220_v4  ;;  %v223_v8 = vld [vmem:[%s2040_s1 + $0xd8] sm:$0xff] }
  0x31   : > { %359 = vst [vmem:[%s2041_s2 + $0x98] sm:$0xff] %v215_v60  ;;  %360 = vst [vmem:[%s2041_s2 + $0xa0] sm:$0xff] %v216_v61  ;;  %v224_v9 = vld [vmem:[%s2040_s1 + $0xe0] sm:$0xff]  ;;  %v225_v10 = vld [vmem:[%s2040_s1 + $0xe8] sm:$0xff]  ;;  %v1205_v11 = vpack.c.bf16 %v223_v8, %v222_v6 }
  0x32   : > { %331 = vst [vmem:[#allocation3 + $0x38] sm:$0xff] %v1199_v57  ;;  %332 = vst [vmem:[#allocation3 + $0x70] sm:$0xff] %v1200_v58  ;;  %v1206_v12 = vpack.c.bf16 %v225_v10, %v224_v9  ;;  %v226_v13 = vld [vmem:[%s2040_s1 + $0xf0] sm:$0xff]  ;;  %v227_v14 = vld [vmem:[%s2040_s1 + $0xf8] sm:$0xff] }
  0x33   : > { %361 = vst [vmem:[%s2041_s2 + $0xa8] sm:$0xff] %v217_v63  ;;  %362 = vst [vmem:[%s2041_s2 + $0xb0] sm:$0xff] %v218_v0  ;;  %v1207_v15 = vpack.c.bf16 %v227_v14, %v226_v13 }
  0x34   : > { %363 = vst [vmem:[%s2041_s2 + $0xb8] sm:$0xff] %v219_v1  ;;  %333 = vst [vmem:[#allocation3 + $0x60] sm:$0xff] %v1201_v62 }
  0x35   : > { %364 = vst [vmem:[%s2041_s2 + $0xc0] sm:$0xff] %v220_v4  ;;  %365 = vst [vmem:[%s2041_s2 + $0xc8] sm:$0xff] %v221_v5 }
  0x36   : > { %366 = vst [vmem:[%s2041_s2 + $0xd0] sm:$0xff] %v222_v6  ;;  %334 = vst [vmem:[#allocation3 + $0x18] sm:$0xff] %v1202_v2 }
  0x37   : > { %335 = vst [vmem:[#allocation3 + $0x20] sm:$0xff] %v1203_v3  ;;  %367 = vst [vmem:[%s2041_s2 + $0xd8] sm:$0xff] %v223_v8 }
  0x38   : > { %368 = vst [vmem:[%s2041_s2 + $0xe0] sm:$0xff] %v224_v9  ;;  %369 = vst [vmem:[%s2041_s2 + $0xe8] sm:$0xff] %v225_v10 }
  0x39   : > { %336 = vst [vmem:[#allocation3 + $0x10] sm:$0xff] %v1204_v7  ;;  %370 = vst [vmem:[%s2041_s2 + $0xf0] sm:$0xff] %v226_v13 }
  0x3a   : > { %371 = vst [vmem:[%s2041_s2 + $0xf8] sm:$0xff] %v227_v14  ;;  %337 = vst [vmem:[#allocation3 + $0x30] sm:$0xff] %v1205_v11 }
  0x3b   : > { %338 = vst [vmem:[#allocation3 + $0x28] sm:$0xff] %v1206_v12  ;;  %339 = vst [vmem:[#allocation3 + $0x58] sm:$0xff] %v1207_v15 }
  0x3c PF: > { %v1264_v16 = vld [vmem:[#allocation2 + $0xc] ss:$112 sps:$4 sm:$0xff]   ;;  %v1266_v17 = vld [vmem:[#allocation2 + $0x8] ss:$112 sps:$4 sm:$0xff]   ;;  %v1267_v18 = vld [vmem:[#allocation2 + $0x64] ss:$144 sps:$4 sm:$0xff]  }
  0x3d   : > { %660 = vmatprep.subr.bf16.mxu0 %v1264_v16  ;;  %1224 = vmatprep.subr.bf16.mxu1 %v1264_v16  ;;  %v1269_v19 = vld [vmem:[#allocation2 + $0x60] ss:$144 sps:$4 sm:$0xff]   ;;  %v1270_v20 = vld [vmem:[#allocation2 + $0xec] ss:$-48 sps:$4 sm:$0xff]   ;;  %v1272_v21 = vld [vmem:[#allocation2 + $0xe8] ss:$-48 sps:$4 sm:$0xff]  }
  0x3e   : > { %661 = vmatpush1.bf16.msra.mxu0 %v1266_v17  ;;  %1240 = vmatpush1.bf16.msra.mxu1 %v1266_v17  ;;  %v1273_v22 = vld [vmem:[#allocation2 + $0x84] ss:$8 sps:$4 sm:$0xff]   ;;  %v1275_v23 = vld [vmem:[#allocation2 + $0x80] ss:$8 sps:$4 sm:$0xff]   ;;  %v390_v27 = vld [vmem:[#allocation2 + $0xd8] sm:$0xff]  ;;  %p1189_p4 = scmp.ne.s32.totalorder %s1105_s10, 2 }
  0x3f   : > { %662 = vmatprep.subr.bf16.mxu0 %v1267_v18  ;;  %1225 = vmatprep.subr.bf16.mxu1 %v1267_v18  ;;  %v1276_v24 = vld [vmem:[#allocation2 + $0x34] ss:$24 sps:$4 sm:$0xff]   ;;  %v1278_v25 = vld [vmem:[#allocation2 + $0x30] ss:$24 sps:$4 sm:$0xff]   ;;  %v391_v28 = vld [vmem:[#allocation2 + $0x18] sm:$0xff] }
  0x40   : > { %v1279_v26 = vld [vmem:[#allocation2 + $0x54] ss:$24 sps:$4 sm:$0xff]   ;;  %v1281_v29 = vld [vmem:[#allocation2 + $0x50] ss:$24 sps:$4 sm:$0xff]   ;;  %v1144_v30 = vcombine.high %v390_v27, %v391_v28  ;;  %v1143_v33 = vcombine.low %v390_v27, %v391_v28  ;;  %v1285_v36 = vld [vmem:[#allocation2 + $0x24] ss:$120 sps:$4 sm:$0xff]  }
  0x41   : > { %v1306_v31 = vld [vmem:[#allocation3 + $0x4] ss:$72 sps:$4 sm:$0xff]   ;;  %v1284_v35 = vld [vmem:[#allocation2 + $0xb0] ss:$-176 sps:$4 sm:$0xff]   ;;  %v404_v49 = vld [vmem:[#allocation2 + $0x38] sm:$0xff] }
  0x42   : > { %663 = vmatpush1.bf16.msra.mxu0 %v1269_v19  ;;  %1241 = vmatpush1.bf16.msra.mxu1 %v1269_v19  ;;  %v1308_v32 = vld [vmem:[#allocation3 + $0x74] ss:$-16 sps:$4 sm:$0xff]   ;;  %v1287_v37 = vld [vmem:[#allocation2 + $0x20] ss:$120 sps:$4 sm:$0xff]   ;;  %v1293_v41 = vld [vmem:[#allocation2 + $0x10] ss:$24 sps:$4 sm:$0xff]  }
  0x43   : > { %664 = vmatprep.subr.bf16.mxu0 %v1270_v20  ;;  %1226 = vmatprep.subr.bf16.mxu1 %v1270_v20  ;;  %v1282_v34 = vld [vmem:[#allocation2 + $0xb4] ss:$-176 sps:$4 sm:$0xff]   ;;  %v1290_v39 = vld [vmem:[#allocation2 + $0xa0] ss:$88 sps:$4 sm:$0xff]   ;;  %v1296_v43 = vld [vmem:[#allocation2 + $0xa8] ss:$40 sps:$4 sm:$0xff]  }
  0x44   : > { %692 = vmatprep.mubr.bf16.mxu0 %v1306_v31  ;;  %732 = vmatprep.mubr.bf16.mxu1 %v1308_v32  ;;  %v1288_v38 = vld [vmem:[#allocation2 + $0xa4] ss:$88 sps:$4 sm:$0xff]   ;;  %v1291_v40 = vld [vmem:[#allocation2 + $0x14] ss:$24 sps:$4 sm:$0xff]   ;;  %v1299_v45 = vld [vmem:[#allocation2 + $0x70] ss:$80 sps:$4 sm:$0xff]  }
  0x45   : > { %v1294_v42 = vld [vmem:[#allocation2 + $0xac] ss:$40 sps:$4 sm:$0xff]   ;;  %v1302_v47 = vld [vmem:[#allocation2 + $0xe0] ss:$-80 sps:$4 sm:$0xff]   ;;  %v405_v50 = vld [vmem:[#allocation2 + $0x58] sm:$0xff] }
  0x46   : > { %665 = vmatpush1.bf16.msra.mxu0 %v1272_v21  ;;  %1242 = vmatpush1.bf16.msra.mxu1 %v1272_v21  ;;  %v1297_v44 = vld [vmem:[#allocation2 + $0x74] ss:$80 sps:$4 sm:$0xff]   ;;  %v1305_v51 = vld [vmem:[#allocation2 + $0x40] ss:$136 sps:$4 sm:$0xff]   ;;  %v1158_v52 = vcombine.high %v404_v49, %v405_v50  ;;  %v1157_v53 = vcombine.low %v404_v49, %v405_v50  ;;  %v1312_v56 = vld [vmem:[#allocation3 + $0x6c] ss:$16 sps:$4 sm:$0xff]  }
  0x47   : > { %666 = vmatprep.subr.bf16.mxu0 %v1273_v22  ;;  %1227 = vmatprep.subr.bf16.mxu1 %v1273_v22  ;;  %v1300_v46 = vld [vmem:[#allocation2 + $0xe4] ss:$-80 sps:$4 sm:$0xff]   ;;  %v1310_v54 = vld [vmem:[#allocation3] ss:$72 sps:$4 sm:$0xff]   ;;  %v1323_v3 = vld [vmem:[#allocation3 + $0x2c] ss:$48 sps:$4 sm:$0xff]  }
  0x48   : > { %v1303_v48 = vld [vmem:[#allocation2 + $0x44] ss:$136 sps:$4 sm:$0xff]   ;;  %v1311_v55 = vld [vmem:[#allocation3 + $0x70] ss:$-16 sps:$4 sm:$0xff]   ;;  %v1316_v60 = vld [vmem:[#allocation3 + $0x68] ss:$16 sps:$4 sm:$0xff]  }
  0x49   : > { %v1314_v57 = vld [vmem:[#allocation3 + $0x1c] ss:$8 sps:$4 sm:$0xff]   ;;  %v384_v58 = vld [vmem:[#allocation3 + $0x10] sm:$0xff]  ;;  %v1317_v61 = vld [vmem:[#allocation3 + $0x18] ss:$8 sps:$4 sm:$0xff]  }
  0x4a   : > { %667 = vmatpush1.bf16.msra.mxu0 %v1275_v23  ;;  %1243 = vmatpush1.bf16.msra.mxu1 %v1275_v23  ;;  %v385_v59 = vld [vmem:[#allocation3 + $0x30] sm:$0xff]  ;;  %v1321_v2 = vld [vmem:[#allocation3 + $0x44] ss:$-8 sps:$4 sm:$0xff]   ;;  %v1325_v4 = vld [vmem:[#allocation3 + $0x40] ss:$-8 sps:$4 sm:$0xff]  }
  0x4b   : > { %668 = vmatprep.subr.bf16.mxu0 %v1276_v24  ;;  %1228 = vmatprep.subr.bf16.mxu1 %v1276_v24  ;;  %v1318_v62 = vld [vmem:[#allocation3 + $0xc] ss:$72 sps:$4 sm:$0xff]   ;;  %v1138_v63 = vcombine.high %v384_v58, %v385_v59  ;;  %v1320_v0 = vld [vmem:[#allocation3 + $0x8] ss:$72 sps:$4 sm:$0xff]   ;;  %v1137_v1 = vcombine.low %v384_v58, %v385_v59  ;;  %v885_v6 = vld [vmem:[%s2041_s2] sm:$0xff] }
  0x4c   : > { %v1326_v5 = vld [vmem:[#allocation3 + $0x28] ss:$48 sps:$4 sm:$0xff]   ;;  %v901_v7 = vld [vmem:[%s2041_s2 + $0x80] sm:$0xff]  ;;  %v887_v16 = vld [vmem:[%s2041_s2 + $0x10] sm:$0xff] }
  0x4d   : > { %v886_v10 = vld [vmem:[%s2041_s2 + $0x8] sm:$0xff]  ;;  %v903_v17 = vld [vmem:[%s2041_s2 + $0x90] sm:$0xff]  ;;  %v888_v24 = vld [vmem:[%s2041_s2 + $0x18] sm:$0xff] }
  0x4e   : > { %669 = vmatpush1.bf16.msra.mxu0 %v1278_v25  ;;  %1244 = vmatpush1.bf16.msra.mxu1 %v1278_v25  ;;  %v902_v11 = vld [vmem:[%s2041_s2 + $0x88] sm:$0xff]  ;;  %v904_v25 = vld [vmem:[%s2041_s2 + $0x98] sm:$0xff]  ;;  %v905_v31 = vld [vmem:[%s2041_s2 + $0xa0] sm:$0xff] }
  0x4f   : > { %670 = vmatprep.subr.bf16.mxu0 %v1279_v26  ;;  %1229 = vmatprep.subr.bf16.mxu1 %v1279_v26  ;;  %v893_v58 = vld [vmem:[%s2041_s2 + $0x40] sm:$0xff] }
  0x50   : > { %v909_v59 = vld [vmem:[%s2041_s2 + $0xc0] sm:$0xff] }
  0x52   : > { %671 = vmatpush1.bf16.msra.mxu0 %v1281_v29  ;;  %1245 = vmatpush1.bf16.msra.mxu1 %v1281_v29 }
  0x53   : > { %672 = vmatprep.subr.bf16.mxu0 %v1144_v30  ;;  %1230 = vmatprep.subr.bf16.mxu1 %v1144_v30  ;;  %v889_v30 = vld [vmem:[%s2041_s2 + $0x20] sm:$0xff] }
  0x56   : > { %673 = vmatpush1.bf16.msra.mxu0 %v1143_v33  ;;  %1246 = vmatpush1.bf16.msra.mxu1 %v1143_v33 }
  0x57   : > { %674 = vmatprep.subr.bf16.mxu0 %v1282_v34  ;;  %1231 = vmatprep.subr.bf16.mxu1 %v1282_v34 }
  0x5a   : > { %675 = vmatpush1.bf16.msra.mxu0 %v1284_v35  ;;  %1247 = vmatpush1.bf16.msra.mxu1 %v1284_v35 }
  0x5b   : > { %676 = vmatprep.subr.bf16.mxu0 %v1285_v36  ;;  %1232 = vmatprep.subr.bf16.mxu1 %v1285_v36 }
  0x5e   : > { %677 = vmatpush2.bf16.msra.mxu0 %v1287_v37  ;;  %1248 = vmatpush2.bf16.msra.mxu1 %v1287_v37 }
  0x5f   : > { %678 = vmatprep.subr.bf16.mxu0 %v1288_v38  ;;  %1233 = vmatprep.subr.bf16.mxu1 %v1288_v38  ;;  %v890_v38 = vld [vmem:[%s2041_s2 + $0x28] sm:$0xff] }
  0x62   : > { %679 = vmatpush2.bf16.msra.mxu0 %v1290_v39  ;;  %1249 = vmatpush2.bf16.msra.mxu1 %v1290_v39  ;;  %v906_v39 = vld [vmem:[%s2041_s2 + $0xa8] sm:$0xff] }
  0x63   : > { %680 = vmatprep.subr.bf16.mxu0 %v1291_v40  ;;  %1234 = vmatprep.subr.bf16.mxu1 %v1291_v40 }
  0x66   : > { %681 = vmatpush2.bf16.msra.mxu0 %v1293_v41  ;;  %1250 = vmatpush2.bf16.msra.mxu1 %v1293_v41 }
  0x67   : > { %682 = vmatprep.subr.bf16.mxu0 %v1294_v42  ;;  %1235 = vmatprep.subr.bf16.mxu1 %v1294_v42 }
  0x6a   : > { %683 = vmatpush2.bf16.msra.mxu0 %v1296_v43  ;;  %1251 = vmatpush2.bf16.msra.mxu1 %v1296_v43 }
  0x6b   : > { %684 = vmatprep.subr.bf16.mxu0 %v1297_v44  ;;  %1236 = vmatprep.subr.bf16.mxu1 %v1297_v44  ;;  %v891_v44 = vld [vmem:[%s2041_s2 + $0x30] sm:$0xff] }
  0x6e   : > { %685 = vmatpush2.bf16.msra.mxu0 %v1299_v45  ;;  %1252 = vmatpush2.bf16.msra.mxu1 %v1299_v45  ;;  %v907_v45 = vld [vmem:[%s2041_s2 + $0xb0] sm:$0xff] }
  0x6f   : > { %686 = vmatprep.subr.bf16.mxu0 %v1300_v46  ;;  %1237 = vmatprep.subr.bf16.mxu1 %v1300_v46 }
  0x72   : > { %687 = vmatpush2.bf16.msra.mxu0 %v1302_v47  ;;  %1253 = vmatpush2.bf16.msra.mxu1 %v1302_v47 }
  0x73   : > { %688 = vmatprep.subr.bf16.mxu0 %v1303_v48  ;;  %1238 = vmatprep.subr.bf16.mxu1 %v1303_v48 }
  0x76   : > { %689 = vmatpush2.bf16.msra.mxu0 %v1305_v51  ;;  %1254 = vmatpush2.bf16.msra.mxu1 %v1305_v51 }
  0x77   : > { %690 = vmatprep.subr.bf16.mxu0 %v1158_v52  ;;  %1239 = vmatprep.subr.bf16.mxu1 %v1158_v52  ;;  %v892_v52 = vld [vmem:[%s2041_s2 + $0x38] sm:$0xff] }
  0x7a   : > { %691 = vmatpush2.bf16.msra.mxu0 %v1157_v53  ;;  %1255 = vmatpush2.bf16.msra.mxu1 %v1157_v53  ;;  %v908_v53 = vld [vmem:[%s2041_s2 + $0xb8] sm:$0xff] }
  0x7d   : > { %693 = vmatmul.mubr.bf16.vlgmr.msra.gmra.mxu0 %v1310_v54  ;;  %733 = vmatmul.mubr.bf16.vlgmr.msra.gmra.mxu1 %v1311_v55 }
  0x7e   : > { %702 = vmatprep.mubr.bf16.mxu0 %v1312_v56  ;;  %742 = vmatprep.mubr.bf16.mxu1 %v1314_v57 }
  0x85   : > { %703 = vmatmul.mubr.bf16.gmra.mxu0 %v1316_v60  ;;  %743 = vmatmul.mubr.bf16.gmra.mxu1 %v1317_v61 }
  0x86   : > { %712 = vmatprep.mubr.bf16.mxu0 %v1318_v62  ;;  %752 = vmatprep.mubr.bf16.mxu1 %v1138_v63 }
  0x8d   : > { %713 = vmatmul.mubr.bf16.gmra.mxu0 %v1320_v0  ;;  %753 = vmatmul.mubr.bf16.gmra.mxu1 %v1137_v1 }
  0x8e   : > { %722 = vmatprep.mubr.bf16.mxu0 %v1321_v2  ;;  %762 = vmatprep.mubr.bf16.mxu1 %v1323_v3  ;;  %v894_v2 = vld [vmem:[%s2041_s2 + $0x48] sm:$0xff] }
  0x8f   : > { %v910_v3 = vld [vmem:[%s2041_s2 + $0xc8] sm:$0xff] }
  0x95   : > { %723 = vmatmul.mubr.bf16.gmra.mxu0 %v1325_v4  ;;  %763 = vmatmul.mubr.bf16.gmra.mxu1 %v1326_v5 }
 0x13d   : > { %v694_v8 = vpop.f32.mrf.mxu0  ;;  %v734_v9 = vpop.f32.mrf.mxu1 }
 0x13e   : > { %v917_v12 = vadd.f32 %v885_v6, %v694_v8  ;;  %v933_v13 = vadd.f32 %v901_v7, %v734_v9 }
 0x13f   : > { %v696_v14 = vpop.f32.mrf.mxu0  ;;  %v736_v15 = vpop.f32.mrf.mxu1 }
 0x140   : > { %949 = vst [vmem:[%s2041_s2] sm:$0xff] %v917_v12  ;;  %965 = vst [vmem:[%s2041_s2 + $0x80] sm:$0xff] %v933_v13  ;;  %v1208_v18 = vpack.c.bf16 %v696_v14, %v694_v8  ;;  %v918_v19 = vadd.f32 %v886_v10, %v696_v14  ;;  %v1216_v20 = vpack.c.bf16 %v736_v15, %v734_v9  ;;  %v895_v8 = vld [vmem:[%s2041_s2 + $0x50] sm:$0xff] }
 0x141   : > { %v934_v21 = vadd.f32 %v902_v11, %v736_v15  ;;  %v698_v22 = vpop.f32.mrf.mxu0  ;;  %v738_v23 = vpop.f32.mrf.mxu1  ;;  %v911_v9 = vld [vmem:[%s2041_s2 + $0xd0] sm:$0xff] }
 0x142   : > { %869 = vst [vmem:[#allocation3] sm:$0xff] %v1208_v18  ;;  %950 = vst [vmem:[%s2041_s2 + $0x8] sm:$0xff] %v918_v19  ;;  %v919_v26 = vadd.f32 %v887_v16, %v698_v22  ;;  %v935_v27 = vadd.f32 %v903_v17, %v738_v23  ;;  %v896_v16 = vld [vmem:[%s2041_s2 + $0x58] sm:$0xff] }
 0x143   : > { %877 = vst [vmem:[#allocation3 + $0x70] sm:$0xff] %v1216_v20  ;;  %966 = vst [vmem:[%s2041_s2 + $0x88] sm:$0xff] %v934_v21  ;;  %v700_v28 = vpop.f32.mrf.mxu0  ;;  %v740_v29 = vpop.f32.mrf.mxu1  ;;  %v912_v17 = vld [vmem:[%s2041_s2 + $0xd8] sm:$0xff] }
 0x144   : > { %951 = vst [vmem:[%s2041_s2 + $0x10] sm:$0xff] %v919_v26  ;;  %967 = vst [vmem:[%s2041_s2 + $0x90] sm:$0xff] %v935_v27  ;;  %v1209_v32 = vpack.c.bf16 %v700_v28, %v698_v22  ;;  %v920_v33 = vadd.f32 %v888_v24, %v700_v28  ;;  %v1217_v34 = vpack.c.bf16 %v740_v29, %v738_v23  ;;  %v897_v22 = vld [vmem:[%s2041_s2 + $0x60] sm:$0xff] }
 0x145   : > { %v936_v35 = vadd.f32 %v904_v25, %v740_v29  ;;  %v704_v36 = vpop.f32.mrf.mxu0  ;;  %v744_v37 = vpop.f32.mrf.mxu1  ;;  %v913_v23 = vld [vmem:[%s2041_s2 + $0xe0] sm:$0xff] }
 0x146   : > { %870 = vst [vmem:[#allocation3 + $0x48] sm:$0xff] %v1209_v32  ;;  %952 = vst [vmem:[%s2041_s2 + $0x18] sm:$0xff] %v920_v33  ;;  %v921_v40 = vadd.f32 %v889_v30, %v704_v36  ;;  %v937_v41 = vadd.f32 %v905_v31, %v744_v37  ;;  %v898_v30 = vld [vmem:[%s2041_s2 + $0x68] sm:$0xff] }
 0x147   : > { %878 = vst [vmem:[#allocation3 + $0x60] sm:$0xff] %v1217_v34  ;;  %968 = vst [vmem:[%s2041_s2 + $0x98] sm:$0xff] %v936_v35  ;;  %v706_v42 = vpop.f32.mrf.mxu0  ;;  %v746_v43 = vpop.f32.mrf.mxu1  ;;  %v914_v31 = vld [vmem:[%s2041_s2 + $0xe8] sm:$0xff] }
 0x148   : > { %953 = vst [vmem:[%s2041_s2 + $0x20] sm:$0xff] %v921_v40  ;;  %969 = vst [vmem:[%s2041_s2 + $0xa0] sm:$0xff] %v937_v41  ;;  %v1210_v46 = vpack.c.bf16 %v706_v42, %v704_v36  ;;  %v922_v47 = vadd.f32 %v890_v38, %v706_v42  ;;  %v1218_v48 = vpack.c.bf16 %v746_v43, %v744_v37  ;;  %v899_v36 = vld [vmem:[%s2041_s2 + $0x70] sm:$0xff] }
 0x149   : > { %v938_v49 = vadd.f32 %v906_v39, %v746_v43  ;;  %v708_v50 = vpop.f32.mrf.mxu0  ;;  %v748_v51 = vpop.f32.mrf.mxu1  ;;  %v915_v37 = vld [vmem:[%s2041_s2 + $0xf0] sm:$0xff] }
 0x14a   : > { %871 = vst [vmem:[#allocation3 + $0x68] sm:$0xff] %v1210_v46  ;;  %954 = vst [vmem:[%s2041_s2 + $0x28] sm:$0xff] %v922_v47  ;;  %v923_v54 = vadd.f32 %v891_v44, %v708_v50  ;;  %v939_v55 = vadd.f32 %v907_v45, %v748_v51  ;;  %v900_v44 = vld [vmem:[%s2041_s2 + $0x78] sm:$0xff] }
 0x14b   : > { %879 = vst [vmem:[#allocation3 + $0x18] sm:$0xff] %v1218_v48  ;;  %970 = vst [vmem:[%s2041_s2 + $0xa8] sm:$0xff] %v938_v49  ;;  %v710_v56 = vpop.f32.mrf.mxu0  ;;  %v750_v57 = vpop.f32.mrf.mxu1  ;;  %v916_v45 = vld [vmem:[%s2041_s2 + $0xf8] sm:$0xff] }
 0x14c   : > { %955 = vst [vmem:[%s2041_s2 + $0x30] sm:$0xff] %v923_v54  ;;  %971 = vst [vmem:[%s2041_s2 + $0xb0] sm:$0xff] %v939_v55  ;;  %v1211_v60 = vpack.c.bf16 %v710_v56, %v708_v50  ;;  %v924_v61 = vadd.f32 %v892_v52, %v710_v56  ;;  %v1219_v62 = vpack.c.bf16 %v750_v57, %v748_v51 }
 0x14d   : > { %v940_v63 = vadd.f32 %v908_v53, %v750_v57  ;;  %v714_v0 = vpop.f32.mrf.mxu0  ;;  %v754_v1 = vpop.f32.mrf.mxu1 }
 0x14e   : > { %872 = vst [vmem:[#allocation3 + $0x78] sm:$0xff] %v1211_v60  ;;  %956 = vst [vmem:[%s2041_s2 + $0x38] sm:$0xff] %v924_v61  ;;  %v925_v4 = vadd.f32 %v893_v58, %v714_v0  ;;  %v941_v5 = vadd.f32 %v909_v59, %v754_v1 }
 0x14f   : > { %880 = vst [vmem:[#allocation3 + $0x20] sm:$0xff] %v1219_v62  ;;  %972 = vst [vmem:[%s2041_s2 + $0xb8] sm:$0xff] %v940_v63  ;;  %v716_v6 = vpop.f32.mrf.mxu0  ;;  %v756_v7 = vpop.f32.mrf.mxu1 }
 0x150   : > { %957 = vst [vmem:[%s2041_s2 + $0x40] sm:$0xff] %v925_v4  ;;  %973 = vst [vmem:[%s2041_s2 + $0xc0] sm:$0xff] %v941_v5  ;;  %v1212_v10 = vpack.c.bf16 %v716_v6, %v714_v0  ;;  %v926_v11 = vadd.f32 %v894_v2, %v716_v6  ;;  %v1220_v12 = vpack.c.bf16 %v756_v7, %v754_v1 }
 0x151   : > { %v942_v13 = vadd.f32 %v910_v3, %v756_v7  ;;  %v718_v14 = vpop.f32.mrf.mxu0  ;;  %v758_v15 = vpop.f32.mrf.mxu1 }
 0x152   : > { %873 = vst [vmem:[#allocation3 + $0x8] sm:$0xff] %v1212_v10  ;;  %958 = vst [vmem:[%s2041_s2 + $0x48] sm:$0xff] %v926_v11  ;;  %v927_v18 = vadd.f32 %v895_v8, %v718_v14  ;;  %v943_v19 = vadd.f32 %v911_v9, %v758_v15 }
 0x153   : > { %881 = vst [vmem:[#allocation3 + $0x10] sm:$0xff] %v1220_v12  ;;  %974 = vst [vmem:[%s2041_s2 + $0xc8] sm:$0xff] %v942_v13  ;;  %v720_v20 = vpop.f32.mrf.mxu0  ;;  %v760_v21 = vpop.f32.mrf.mxu1 }
 0x154   : > { %959 = vst [vmem:[%s2041_s2 + $0x50] sm:$0xff] %v927_v18  ;;  %975 = vst [vmem:[%s2041_s2 + $0xd0] sm:$0xff] %v943_v19  ;;  %v1213_v24 = vpack.c.bf16 %v720_v20, %v718_v14  ;;  %v928_v25 = vadd.f32 %v896_v16, %v720_v20  ;;  %v1221_v26 = vpack.c.bf16 %v760_v21, %v758_v15 }
 0x155   : > { %v944_v27 = vadd.f32 %v912_v17, %v760_v21  ;;  %v724_v28 = vpop.f32.mrf.mxu0  ;;  %v764_v29 = vpop.f32.mrf.mxu1 }
 0x156   : > { %874 = vst [vmem:[#allocation3 + $0x50] sm:$0xff] %v1213_v24  ;;  %960 = vst [vmem:[%s2041_s2 + $0x58] sm:$0xff] %v928_v25  ;;  %v929_v32 = vadd.f32 %v897_v22, %v724_v28  ;;  %v945_v33 = vadd.f32 %v913_v23, %v764_v29 }
 0x157   : > { %882 = vst [vmem:[#allocation3 + $0x30] sm:$0xff] %v1221_v26  ;;  %976 = vst [vmem:[%s2041_s2 + $0xd8] sm:$0xff] %v944_v27  ;;  %v726_v34 = vpop.f32.mrf.mxu0  ;;  %v766_v35 = vpop.f32.mrf.mxu1 }
 0x158   : > { %961 = vst [vmem:[%s2041_s2 + $0x60] sm:$0xff] %v929_v32  ;;  %977 = vst [vmem:[%s2041_s2 + $0xe0] sm:$0xff] %v945_v33  ;;  %v1214_v38 = vpack.c.bf16 %v726_v34, %v724_v28  ;;  %v930_v39 = vadd.f32 %v898_v30, %v726_v34  ;;  %v1222_v40 = vpack.c.bf16 %v766_v35, %v764_v29 }
 0x159   : > { %v946_v41 = vadd.f32 %v914_v31, %v766_v35  ;;  %v728_v42 = vpop.f32.mrf.mxu0  ;;  %v768_v43 = vpop.f32.mrf.mxu1 }
 0x15a   : > { %875 = vst [vmem:[#allocation3 + $0x40] sm:$0xff] %v1214_v38  ;;  %962 = vst [vmem:[%s2041_s2 + $0x68] sm:$0xff] %v930_v39  ;;  %v931_v46 = vadd.f32 %v899_v36, %v728_v42  ;;  %v947_v47 = vadd.f32 %v915_v37, %v768_v43 }
 0x15b   : > { %883 = vst [vmem:[#allocation3 + $0x28] sm:$0xff] %v1222_v40  ;;  %978 = vst [vmem:[%s2041_s2 + $0xe8] sm:$0xff] %v946_v41  ;;  %v730_v48 = vpop.f32.mrf.mxu0  ;;  %v770_v49 = vpop.f32.mrf.mxu1  ;;  %984 = sbr.rel (%p1189_p4) target bundleno = 371 (0x173), region = 67 }
 0x15c   : > { %963 = vst [vmem:[%s2041_s2 + $0x70] sm:$0xff] %v931_v46  ;;  %979 = vst [vmem:[%s2041_s2 + $0xf0] sm:$0xff] %v947_v47  ;;  %v1215_v50 = vpack.c.bf16 %v730_v48, %v728_v42  ;;  %v932_v51 = vadd.f32 %v900_v44, %v730_v48  ;;  %v1223_v52 = vpack.c.bf16 %v770_v49, %v768_v43 }
 0x15d   : > { %v948_v53 = vadd.f32 %v916_v45, %v770_v49 }
 0x15e   : > { %876 = vst [vmem:[#allocation3 + $0x38] sm:$0xff] %v1215_v50  ;;  %964 = vst [vmem:[%s2041_s2 + $0x78] sm:$0xff] %v932_v51 }
 0x15f   : > { %884 = vst [vmem:[#allocation3 + $0x58] sm:$0xff] %v1223_v52  ;;  %980 = vst [vmem:[%s2041_s2 + $0xf8] sm:$0xff] %v948_v53 }
 0x160   : > { %v985_v54 = vld [vmem:[%s2041_s2] sm:$0xff]  ;;  %v986_v55 = vld [vmem:[%s2041_s2 + $0x8] sm:$0xff]  ;;  %v987_v56 = vld [vmem:[%s2041_s2 + $0x10] sm:$0xff] }
 0x161   : > { %v1017_v57 = vmul.f32 0.25, %v985_v54  ;;  %v1018_v58 = vmul.f32 0.25, %v986_v55  ;;  %v1019_v59 = vmul.f32 0.25, %v987_v56  ;;  %v988_v60 = vld [vmem:[%s2041_s2 + $0x18] sm:$0xff]  ;;  %v989_v61 = vld [vmem:[%s2041_s2 + $0x20] sm:$0xff]  ;;  %v990_v62 = vld [vmem:[%s2041_s2 + $0x28] sm:$0xff] }
 0x162   : > { %v1020_v63 = vmul.f32 0.25, %v988_v60  ;;  %v1021_v0 = vmul.f32 0.25, %v989_v61  ;;  %v1022_v1 = vmul.f32 0.25, %v990_v62  ;;  %v991_v2 = vld [vmem:[%s2041_s2 + $0x30] sm:$0xff]  ;;  %v992_v3 = vld [vmem:[%s2041_s2 + $0x38] sm:$0xff]  ;;  %v993_v4 = vld [vmem:[%s2041_s2 + $0x40] sm:$0xff] }
 0x163   : > { %1049 = vst [vmem:[%s2041_s2] sm:$0xff] %v1017_v57  ;;  %1050 = vst [vmem:[%s2041_s2 + $0x8] sm:$0xff] %v1018_v58  ;;  %v1023_v5 = vmul.f32 0.25, %v991_v2  ;;  %v1024_v6 = vmul.f32 0.25, %v992_v3  ;;  %v1025_v7 = vmul.f32 0.25, %v993_v4  ;;  %v994_v8 = vld [vmem:[%s2041_s2 + $0x48] sm:$0xff]  ;;  %v995_v9 = vld [vmem:[%s2041_s2 + $0x50] sm:$0xff] }
 0x164   : > { %1051 = vst [vmem:[%s2041_s2 + $0x10] sm:$0xff] %v1019_v59  ;;  %v996_v10 = vld [vmem:[%s2041_s2 + $0x58] sm:$0xff]  ;;  %1052 = vst [vmem:[%s2041_s2 + $0x18] sm:$0xff] %v1020_v63  ;;  %v1026_v11 = vmul.f32 0.25, %v994_v8  ;;  %v1027_v12 = vmul.f32 0.25, %v995_v9  ;;  %v997_v14 = vld [vmem:[%s2041_s2 + $0x60] sm:$0xff] }
 0x165   : > { %1053 = vst [vmem:[%s2041_s2 + $0x20] sm:$0xff] %v1021_v0  ;;  %1054 = vst [vmem:[%s2041_s2 + $0x28] sm:$0xff] %v1022_v1  ;;  %v1028_v13 = vmul.f32 0.25, %v996_v10  ;;  %v998_v15 = vld [vmem:[%s2041_s2 + $0x68] sm:$0xff]  ;;  %v999_v16 = vld [vmem:[%s2041_s2 + $0x70] sm:$0xff]  ;;  %v1029_v17 = vmul.f32 0.25, %v997_v14 }
 0x166   : > { %1055 = vst [vmem:[%s2041_s2 + $0x30] sm:$0xff] %v1023_v5  ;;  %1056 = vst [vmem:[%s2041_s2 + $0x38] sm:$0xff] %v1024_v6  ;;  %v1030_v18 = vmul.f32 0.25, %v998_v15  ;;  %v1031_v19 = vmul.f32 0.25, %v999_v16  ;;  %v1000_v20 = vld [vmem:[%s2041_s2 + $0x78] sm:$0xff]  ;;  %v1001_v21 = vld [vmem:[%s2041_s2 + $0x80] sm:$0xff] }
 0x167   : > { %1057 = vst [vmem:[%s2041_s2 + $0x40] sm:$0xff] %v1025_v7  ;;  %v1002_v22 = vld [vmem:[%s2041_s2 + $0x88] sm:$0xff]  ;;  %1058 = vst [vmem:[%s2041_s2 + $0x48] sm:$0xff] %v1026_v11  ;;  %v1032_v23 = vmul.f32 0.25, %v1000_v20  ;;  %v1033_v24 = vmul.f32 0.25, %v1001_v21  ;;  %v1003_v26 = vld [vmem:[%s2041_s2 + $0x90] sm:$0xff] }
 0x168   : > { %1059 = vst [vmem:[%s2041_s2 + $0x50] sm:$0xff] %v1027_v12  ;;  %1060 = vst [vmem:[%s2041_s2 + $0x58] sm:$0xff] %v1028_v13  ;;  %v1034_v25 = vmul.f32 0.25, %v1002_v22  ;;  %v1004_v27 = vld [vmem:[%s2041_s2 + $0x98] sm:$0xff]  ;;  %v1005_v28 = vld [vmem:[%s2041_s2 + $0xa0] sm:$0xff]  ;;  %v1035_v29 = vmul.f32 0.25, %v1003_v26 }
 0x169   : > { %1061 = vst [vmem:[%s2041_s2 + $0x60] sm:$0xff] %v1029_v17  ;;  %1062 = vst [vmem:[%s2041_s2 + $0x68] sm:$0xff] %v1030_v18  ;;  %v1036_v30 = vmul.f32 0.25, %v1004_v27  ;;  %v1037_v31 = vmul.f32 0.25, %v1005_v28  ;;  %v1006_v32 = vld [vmem:[%s2041_s2 + $0xa8] sm:$0xff]  ;;  %v1007_v33 = vld [vmem:[%s2041_s2 + $0xb0] sm:$0xff] }
 0x16a   : > { %1063 = vst [vmem:[%s2041_s2 + $0x70] sm:$0xff] %v1031_v19  ;;  %v1008_v34 = vld [vmem:[%s2041_s2 + $0xb8] sm:$0xff]  ;;  %1064 = vst [vmem:[%s2041_s2 + $0x78] sm:$0xff] %v1032_v23  ;;  %v1038_v35 = vmul.f32 0.25, %v1006_v32  ;;  %v1039_v36 = vmul.f32 0.25, %v1007_v33  ;;  %v1009_v38 = vld [vmem:[%s2041_s2 + $0xc0] sm:$0xff] }
 0x16b   : > { %1065 = vst [vmem:[%s2041_s2 + $0x80] sm:$0xff] %v1033_v24  ;;  %1066 = vst [vmem:[%s2041_s2 + $0x88] sm:$0xff] %v1034_v25  ;;  %v1040_v37 = vmul.f32 0.25, %v1008_v34  ;;  %v1010_v39 = vld [vmem:[%s2041_s2 + $0xc8] sm:$0xff]  ;;  %v1011_v40 = vld [vmem:[%s2041_s2 + $0xd0] sm:$0xff]  ;;  %v1041_v41 = vmul.f32 0.25, %v1009_v38 }
 0x16c   : > { %1067 = vst [vmem:[%s2041_s2 + $0x90] sm:$0xff] %v1035_v29  ;;  %1068 = vst [vmem:[%s2041_s2 + $0x98] sm:$0xff] %v1036_v30  ;;  %v1042_v42 = vmul.f32 0.25, %v1010_v39  ;;  %v1043_v43 = vmul.f32 0.25, %v1011_v40  ;;  %v1012_v44 = vld [vmem:[%s2041_s2 + $0xd8] sm:$0xff]  ;;  %v1013_v45 = vld [vmem:[%s2041_s2 + $0xe0] sm:$0xff] }
 0x16d   : > { %1069 = vst [vmem:[%s2041_s2 + $0xa0] sm:$0xff] %v1037_v31  ;;  %v1014_v46 = vld [vmem:[%s2041_s2 + $0xe8] sm:$0xff]  ;;  %1070 = vst [vmem:[%s2041_s2 + $0xa8] sm:$0xff] %v1038_v35  ;;  %v1044_v47 = vmul.f32 0.25, %v1012_v44  ;;  %v1045_v48 = vmul.f32 0.25, %v1013_v45  ;;  %v1015_v50 = vld [vmem:[%s2041_s2 + $0xf0] sm:$0xff] }
 0x16e   : > { %1071 = vst [vmem:[%s2041_s2 + $0xb0] sm:$0xff] %v1039_v36  ;;  %1072 = vst [vmem:[%s2041_s2 + $0xb8] sm:$0xff] %v1040_v37  ;;  %v1046_v49 = vmul.f32 0.25, %v1014_v46  ;;  %v1016_v51 = vld [vmem:[%s2041_s2 + $0xf8] sm:$0xff]  ;;  %v1047_v52 = vmul.f32 0.25, %v1015_v50 }
 0x16f   : > { %1073 = vst [vmem:[%s2041_s2 + $0xc0] sm:$0xff] %v1041_v41  ;;  %1074 = vst [vmem:[%s2041_s2 + $0xc8] sm:$0xff] %v1042_v42  ;;  %v1048_v53 = vmul.f32 0.25, %v1016_v51 }
 0x170   : > { %1075 = vst [vmem:[%s2041_s2 + $0xd0] sm:$0xff] %v1043_v43  ;;  %1076 = vst [vmem:[%s2041_s2 + $0xd8] sm:$0xff] %v1044_v47 }
 0x171   : > { %1077 = vst [vmem:[%s2041_s2 + $0xe0] sm:$0xff] %v1045_v48  ;;  %1078 = vst [vmem:[%s2041_s2 + $0xe8] sm:$0xff] %v1046_v49 }
 0x172   : > { %1079 = vst [vmem:[%s2041_s2 + $0xf0] sm:$0xff] %v1047_v52  ;;  %1080 = vst [vmem:[%s2041_s2 + $0xf8] sm:$0xff] %v1048_v53 }
 0x173 PF: > { %s12_s9 = sadd.s32 1, %s1335_s9  }
 0x174   : > { %p9_p5 = scmp.ge.s32.totalorder %s12_s9, 5  }
 0x176   :  { %11 = sbr.rel (!%p9_p5) target bundleno = 1 (0x1), region = 98 }

</bundles_post_ra>
